<compile_context>
chip_gen: v6e
topology: v6e:2x2x1
jax: 0.10.0
libtpu: 0.0.40
codegen_flags: <defaults>
</compile_context>

<pallas_src>
import jax
import jax.numpy as jnp
from jax.experimental import pallas as pl
from jax.experimental.pallas import tpu as pltpu


def _fused_temp_scaled_kernel(inv_t_ref, x_ref, w_ref, b_ref, o_ref):
    """One K step of (x @ W_fused + b) * (1/T), accumulating into o_ref.

    inv_t_ref: (1, 1) f32 SMEM  -- exact 1/temperature, computed in the wrapper.
    x_ref:     (B, tk)  bf16 VMEM activation slice.
    w_ref:     (tk, N)  bf16 VMEM fused-head weight slab (N = A*NUM_CLASSES).
    b_ref:     (1, N)   f32 VMEM fused bias row (resident).
    o_ref:     (B, N)   f32 VMEM output; constant block index across K, so it
               doubles as the accumulator (no scratch needed).
    """
    k = pl.program_id(0)

    @pl.when(k == 0)
    def _():
        o_ref[...] = jnp.zeros_like(o_ref)

    o_ref[...] += jnp.dot(
        x_ref[...], w_ref[...], preferred_element_type=jnp.float32
    )

    @pl.when(k == pl.num_programs(0) - 1)
    def _():
        o_ref[...] = (o_ref[...] + b_ref[...]) * inv_t_ref[0, 0]


def _round_up(x, m):
    return ((x + m - 1) // m) * m


def _pick_tk(d, n, max_tile_bytes=4 << 20, max_tk=8192):
    """K tile: multiple of 128, sized so one bf16 weight tile is <= ~4 MiB.

    Big tiles amortize the ~0.35 us per-grid-step overhead and keep each weight
    DMA fat enough to track the HBM roofline on v5e/v6e/v7x; the byte cap keeps
    the double-buffered tiles far inside v7x's 64 MiB VMEM (32 MiB scoped
    default). The caller zero-pads D up to a multiple of the returned tk.
    """
    n_pad = _round_up(max(n, 1), 128)                 # lane padding of W tile
    tk_budget = (max_tile_bytes // (n_pad * 2)) // 128 * 128
    tk_budget = max(128, min(tk_budget, max_tk))
    return min(tk_budget, _round_up(d, 128))


def _vmem_budget_bytes(b, tk, n):
    """VMEM budget: double-buffered inputs + resident output, padded, 2x headroom."""
    n_pad = _round_up(max(n, 1), 128)
    b_bf16 = _round_up(max(b, 1), 16)     # bf16 packs 16 sublanes per vreg
    b_f32 = _round_up(max(b, 1), 8)
    x_tile = b_bf16 * max(tk, 128) * 2
    w_tile = tk * n_pad * 2
    bias_tile = 8 * n_pad * 4
    out_tile = b_f32 * n_pad * 4
    need = 2 * (x_tile + w_tile + bias_tile) + 2 * out_tile + (1 << 20)
    return int(min(max(2 * need, 4 << 20), 48 << 20))


def prepack_heads(w, b, max_tile_bytes=4 << 20):
    """One-time repack of the A linear heads (hoisted out of the forward path).

    [A, D, C] f32 weights -> one bf16 [D_pad, A*C] lane-fused slab (zero-padded
    along D to a multiple of the chosen K tile); [A, C] biases -> f32 [1, A*C].
    Cache the result: per-call the kernel then reads the weights exactly once.
    """
    A, D, C = w.shape
    N = A * C
    tk = _pick_tk(D, N, max_tile_bytes=max_tile_bytes)
    d_pad = _round_up(D, tk)

    w2 = jnp.transpose(w, (1, 0, 2)).reshape(D, N)
    if d_pad != D:
        w2 = jnp.pad(w2, ((0, d_pad - D), (0, 0)))
    w2 = w2.astype(jnp.bfloat16)
    b2 = b.reshape(1, N).astype(jnp.float32)

    meta = {"A": A, "C": C, "D": D, "D_pad": d_pad, "N": N, "tk": tk}
    return w2, b2, meta


def temperature_scaled_forward(x_nchw, w2, b2, temperature, meta):
    """Forward pass: stacked per-head logits divided by temperature.

    Args:
      x_nchw:      [B, C, H, W] float32 input (NCHW).
      w2, b2:      prepacked fused weights/bias from prepack_heads().
      temperature: [1] float32 (the nn.Parameter, init = 1.5).
      meta:        dict from prepack_heads().
    Returns:
      [A, B, NUM_CLASSES] temperature-scaled logits, float32.
    """
    A, C = meta["A"], meta["C"]
    D, D_pad, N, tk = meta["D"], meta["D_pad"], meta["N"], meta["tk"]
    B = x_nchw.shape[0]
    assert x_nchw.shape[1] * x_nchw.shape[2] * x_nchw.shape[3] == D

    # Per-call work on activations only (cheap, B*D): flatten, bf16 cast, pad.
    x2 = x_nchw.reshape(B, D).astype(jnp.bfloat16)
    if D_pad != D:
        x2 = jnp.pad(x2, ((0, 0), (0, D_pad - D)))

    # Exact 1/T (single scalar, free); lives in SMEM inside the kernel.
    inv_t = (1.0 / temperature.astype(jnp.float32)).reshape(1, 1)

    num_k = D_pad // tk

    grid_spec = pltpu.PrefetchScalarGridSpec(
        num_scalar_prefetch=0,
        grid=(num_k,),
        in_specs=[
            # 1/temperature scalar, whole array in SMEM (no padded VMEM tile).
            pl.BlockSpec(memory_space=pltpu.MemorySpace.SMEM),
            # x: (B, tk) slice along the reduction dim.
            pl.BlockSpec((B, tk), lambda k: (0, k)),
            # fused weights: (tk, A*C) slab per K step (one contiguous stream).
            pl.BlockSpec((tk, N), lambda k: (k, 0)),
            # fused bias row, resident.
            pl.BlockSpec((1, N), lambda k: (0, 0)),
        ],
        # Same block across K => output stays resident in VMEM as the accumulator.
        out_specs=pl.BlockSpec((B, N), lambda k: (0, 0)),
    )

    cost = pl.CostEstimate(
        flops=2 * B * D_pad * N,
        transcendentals=0,
        bytes_accessed=2 * D_pad * N + 2 * B * D_pad + 4 * N + 4 * B * N + 4,
    )

    out2 = pl.pallas_call(
        _fused_temp_scaled_kernel,
        out_shape=jax.ShapeDtypeStruct((B, N), jnp.float32),
        grid_spec=grid_spec,
        compiler_params=pltpu.CompilerParams(
            dimension_semantics=("arbitrary",),  # K is a reduction axis
            vmem_limit_bytes=_vmem_budget_bytes(B, tk, N),
        ),
        cost_estimate=cost,
    )(inv_t, x2, w2, b2)

    # Recover torch.stack(list_of_logits, dim=0) / T layout: (B, A*C) -> (A, B, C).
    return jnp.transpose(out2.reshape(B, A, C), (1, 0, 2))


def model_with_temperature(x_nchw, w, b, temperature):
    """Convenience one-shot API (prefer caching prepack_heads() across calls)."""
    w2, b2, meta = prepack_heads(w, b)
    return temperature_scaled_forward(x_nchw, w2, b2, temperature, meta)


if __name__ == "__main__":
    key = jax.random.PRNGKey(0)
    kx, kw, kb = jax.random.split(key, 3)

    B, Cch, H, W = 2, 4, 16, 16          # NCHW input
    A, NUM_CLASSES = 3, 8                # A attribute heads -> logits list of len A
    D = Cch * H * W

    x = jax.random.normal(kx, (B, Cch, H, W), dtype=jnp.float32)
    w = jax.random.normal(kw, (A, D, NUM_CLASSES), dtype=jnp.float32) * 0.02
    b = jax.random.normal(kb, (A, NUM_CLASSES), dtype=jnp.float32) * 0.1
    # nn.Parameter(torch.ones(1) * 1.5)
    temperature = jnp.ones((1,), dtype=jnp.float32) * 1.5

    # Weight repack/cast is hoisted out of the forward path (done once per model).
    w2, b2, meta = prepack_heads(w, b)

    out = jax.block_until_ready(
        temperature_scaled_forward(x, w2, b2, temperature, meta)
    )

    # Pure-JAX reference on the same bf16-cast inputs (f32 accumulation),
    # matching the kernel's precision path; stack along dim 0 then / temperature.
    xb = x.reshape(B, D).astype(jnp.bfloat16).astype(jnp.float32)
    wb = w.astype(jnp.bfloat16).astype(jnp.float32)
    ref = (jnp.einsum("bd,adc->abc", xb, wb) + b[:, None, :]) / temperature[0]

    assert out.shape == (A, B, NUM_CLASSES)
    assert jnp.allclose(out, ref, atol=2e-3, rtol=2e-3), "mismatch vs reference"

    print("KERNEL_OK")
</pallas_src>

<mosaic_0001>
module attributes {stable_mosaic.version = 11 : i64} {
  func.func @_fused_temp_scaled_kernel(%arg0: i32, %arg1: memref<1x1xf32, #tpu.memory_space<smem>>, %arg2: memref<2x1024xbf16, #tpu.memory_space<vmem>>, %arg3: memref<1024x24xbf16, #tpu.memory_space<vmem>>, %arg4: memref<1x24xf32, #tpu.memory_space<vmem>>, %arg5: memref<2x24xf32, #tpu.memory_space<vmem>>) attributes {dimension_semantics = [#tpu.dimension_semantics<arbitrary>], iteration_bounds = array<i64: 1>, scalar_prefetch = 0 : i64, scratch_operands = 0 : i64, tpu.core_type = #tpu.core_type<tc>, window_params = [{transform_indices = @transform_0, window_bounds = array<i64: 1, 1>}, {transform_indices = @transform_1, window_bounds = array<i64: 2, 1024>}, {transform_indices = @transform_2, window_bounds = array<i64: 1024, 24>}, {pipeline_mode = #tpu.pipeline_mode<synchronous>, transform_indices = @transform_3, window_bounds = array<i64: 1, 24>}, {pipeline_mode = #tpu.pipeline_mode<synchronous>, transform_indices = @transform_4, window_bounds = array<i64: 2, 24>}]} {
    %c0_i32 = arith.constant 0 : i32
    %0 = arith.cmpi eq, %arg0, %c0_i32 : i32
    %1 = arith.extui %0 : i1 to i32
    %c0_i32_0 = arith.constant 0 : i32
    %2 = arith.cmpi ne, %1, %c0_i32_0 : i32
    scf.if %2 {
      %cst_10 = arith.constant 0.000000e+00 : f32
      %12 = vector.broadcast %cst_10 : f32 to vector<2x24xf32>
      %c0_11 = arith.constant 0 : index
      %c0_12 = arith.constant 0 : index
      %13 = vector.load %arg5[%c0_11, %c0_12] : memref<2x24xf32, #tpu.memory_space<vmem>>, vector<2x24xf32>
      tpu.vector_store %arg5[%c0_11, %c0_12], %12 {strides = array<i32>} : memref<2x24xf32, #tpu.memory_space<vmem>>, vector<2x24xf32>,
    } else {
    }
    %c0 = arith.constant 0 : index
    %c0_1 = arith.constant 0 : index
    %3 = vector.load %arg5[%c0, %c0_1] : memref<2x24xf32, #tpu.memory_space<vmem>>, vector<2x24xf32>
    %c0_2 = arith.constant 0 : index
    %c0_3 = arith.constant 0 : index
    %4 = vector.load %arg2[%c0_2, %c0_3] : memref<2x1024xbf16, #tpu.memory_space<vmem>>, vector<2x1024xbf16>
    %c0_4 = arith.constant 0 : index
    %c0_5 = arith.constant 0 : index
    %5 = vector.load %arg3[%c0_4, %c0_5] : memref<1024x24xbf16, #tpu.memory_space<vmem>>, vector<1024x24xbf16>
    %cst = arith.constant dense<0.000000e+00> : vector<2x24xf32>
    %6 = tpu.matmul %4, %5, %cst {dimension_numbers = #tpu.dot_dimension_numbers<[1], [0], [0], [1], [0, 0, 1, 1], [], []>} : vector<2x1024xbf16>, vector<1024x24xbf16>, vector<2x24xf32> -> vector<2x24xf32>
    %7 = arith.addf %3, %6 : vector<2x24xf32>
    %c0_6 = arith.constant 0 : index
    %c0_7 = arith.constant 0 : index
    %8 = vector.load %arg5[%c0_6, %c0_7] : memref<2x24xf32, #tpu.memory_space<vmem>>, vector<2x24xf32>
    tpu.vector_store %arg5[%c0_6, %c0_7], %7 {strides = array<i32>} : memref<2x24xf32, #tpu.memory_space<vmem>>, vector<2x24xf32>,
    %c0_i32_8 = arith.constant 0 : i32
    %9 = arith.cmpi eq, %arg0, %c0_i32_8 : i32
    %10 = arith.extui %9 : i1 to i32
    %c0_i32_9 = arith.constant 0 : i32
    %11 = arith.cmpi ne, %10, %c0_i32_9 : i32
    scf.if %11 {
      %c0_10 = arith.constant 0 : index
      %c0_11 = arith.constant 0 : index
      %12 = vector.load %arg5[%c0_10, %c0_11] : memref<2x24xf32, #tpu.memory_space<vmem>>, vector<2x24xf32>
      %c0_12 = arith.constant 0 : index
      %c0_13 = arith.constant 0 : index
      %13 = vector.load %arg4[%c0_12, %c0_13] : memref<1x24xf32, #tpu.memory_space<vmem>>, vector<1x24xf32>
      %14 = vector.broadcast %13 : vector<1x24xf32> to vector<2x24xf32>
      %15 = arith.addf %12, %14 : vector<2x24xf32>
      %c0_14 = arith.constant 0 : index
      %c0_15 = arith.constant 0 : index
      %16 = memref.load %arg1[%c0_14, %c0_15] : memref<1x1xf32, #tpu.memory_space<smem>>
      %17 = vector.broadcast %16 : f32 to vector<2x24xf32>
      %18 = arith.mulf %15, %17 : vector<2x24xf32>
      %c0_16 = arith.constant 0 : index
      %c0_17 = arith.constant 0 : index
      %19 = vector.load %arg5[%c0_16, %c0_17] : memref<2x24xf32, #tpu.memory_space<vmem>>, vector<2x24xf32>
      tpu.vector_store %arg5[%c0_16, %c0_17], %18 {strides = array<i32>} : memref<2x24xf32, #tpu.memory_space<vmem>>, vector<2x24xf32>,
    } else {
    }
    return
  }
  func.func @transform_0(%arg0: i32) -> (i32, i32) {
    %c0_i32 = arith.constant 0 : i32
    %c0_i32_0 = arith.constant 0 : i32
    %c0_i32_1 = arith.constant 0 : i32
    return %c0_i32, %c0_i32_0 : i32, i32
  }
  func.func @transform_1(%arg0: i32) -> (i32, i32) {
    %c0_i32 = arith.constant 0 : i32
    %c0_i32_0 = arith.constant 0 : i32
    return %c0_i32, %arg0 : i32, i32
  }
  func.func @transform_2(%arg0: i32) -> (i32, i32) {
    %c0_i32 = arith.constant 0 : i32
    %c0_i32_0 = arith.constant 0 : i32
    return %arg0, %c0_i32 : i32, i32
  }
  func.func @transform_3(%arg0: i32) -> (i32, i32) {
    %c0_i32 = arith.constant 0 : i32
    %c0_i32_0 = arith.constant 0 : i32
    %c0_i32_1 = arith.constant 0 : i32
    return %c0_i32, %c0_i32_0 : i32, i32
  }
  func.func @transform_4(%arg0: i32) -> (i32, i32) {
    %c0_i32 = arith.constant 0 : i32
    %c0_i32_0 = arith.constant 0 : i32
    %c0_i32_1 = arith.constant 0 : i32
    return %c0_i32, %c0_i32_0 : i32, i32
  }
}

</mosaic_0001>

<bundles_post_ra>
// kernel: tpu_custom_call.1
= control target key start
LH: loop header
LB: loop body
LE: loop exit
PB: predicated region body
PF: predicated region fallthrough
CT: control target
= control target key end

     0   :  { %v161_v28 = vlaneseq  ;;  %v1034_v36 = vmov 1966171168   ;;  %s1282_s0 = inlined_call_operand.<no memory space> [shape: f32[1,1], index: 0, kind: input, shape index: {}]   ;;  %s1283_s1 = inlined_call_operand.vmem [shape: bf16[2,1024], index: 1, kind: input, shape index: {}]   ;;  %s1284_s2 = inlined_call_operand.vmem [shape: bf16[1024,24], index: 2, kind: input, shape index: {}]   ;;  %s1285_s3 = inlined_call_operand.vmem [shape: f32[1,24], index: 3, kind: input, shape index: {}]   ;;  %s1286_s4 = inlined_call_operand.hbm [shape: f32[2,24], index: 4, kind: output, shape index: {}]  }
   0x1   :  { %v947_v0 = vld [vmem:[%s1284_s2 + $0x78] sm:$0xff]   ;;  %v951_v4 = vld [vmem:[%s1284_s2 + $0x70] sm:$0xff]   ;;  %v955_v8 = vld [vmem:[%s1284_s2 + $0x68] sm:$0xff]   ;;  %v159_v37 = vunpack.c.l.s4 %v1034_v36 }
   0x2   :  { %v948_v1 = vld [vmem:[%s1284_s2 + $0xf8] sm:$0xff]   ;;  %856 = vmatprep.subr.bf16.mxu0 %v947_v0  ;;  %v952_v5 = vld [vmem:[%s1284_s2 + $0xf0] sm:$0xff]   ;;  %v956_v9 = vld [vmem:[%s1284_s2 + $0xe8] sm:$0xff]   ;;  %v162_v33 = vshrl.u32 %v161_v28, 7 }
   0x3   :  { %v949_v2 = vld [vmem:[%s1284_s2 + $0x38] sm:$0xff]   ;;  %878 = vmatprep.subr.bf16.mxu1 %v948_v1  ;;  %v953_v6 = vld [vmem:[%s1284_s2 + $0x30] sm:$0xff]   ;;  %v957_v10 = vld [vmem:[%s1284_s2 + $0x28] sm:$0xff]   ;;  %v160_v40 = vunpack.c.0.s8 %v159_v37 }
   0x4   :  { %v950_v3 = vld [vmem:[%s1284_s2 + $0xb8] sm:$0xff]   ;;  %857 = vmatpush3.bf16.msra.mxu0 %v949_v2  ;;  %v954_v7 = vld [vmem:[%s1284_s2 + $0xb0] sm:$0xff]   ;;  %v958_v11 = vld [vmem:[%s1284_s2 + $0xa8] sm:$0xff]  }
   0x5   :  { %879 = vmatpush3.bf16.msra.mxu1 %v950_v3  ;;  %858 = vmatprep.subr.bf16.mxu0 %v951_v4  ;;  %v959_v12 = vld [vmem:[%s1284_s2 + $0x60] sm:$0xff]   ;;  %v963_v16 = vld [vmem:[%s1284_s2 + $0x58] sm:$0xff]   ;;  %v967_v20 = vld [vmem:[%s1284_s2 + $0x50] sm:$0xff]   ;;  %v1167_v41 = vsub.s32 %v160_v40, %v162_v33 }
   0x6   :  { %880 = vmatprep.subr.bf16.mxu1 %v952_v5  ;;  %v960_v13 = vld [vmem:[%s1284_s2 + $0xe0] sm:$0xff]   ;;  %v964_v17 = vld [vmem:[%s1284_s2 + $0xd8] sm:$0xff]   ;;  %v968_v21 = vld [vmem:[%s1284_s2 + $0xd0] sm:$0xff]  }
   0x7   :  { %v961_v14 = vld [vmem:[%s1284_s2 + $0x20] sm:$0xff]   ;;  %v965_v18 = vld [vmem:[%s1284_s2 + $0x18] sm:$0xff]   ;;  %v969_v22 = vld [vmem:[%s1284_s2 + $0x10] sm:$0xff]  }
   0x8   :  { %859 = vmatpush3.bf16.msra.mxu0 %v953_v6  ;;  %v962_v15 = vld [vmem:[%s1284_s2 + $0xa0] sm:$0xff]   ;;  %v966_v19 = vld [vmem:[%s1284_s2 + $0x98] sm:$0xff]   ;;  %v970_v23 = vld [vmem:[%s1284_s2 + $0x90] sm:$0xff]  }
   0x9   :  { %881 = vmatpush3.bf16.msra.mxu1 %v954_v7  ;;  %860 = vmatprep.subr.bf16.mxu0 %v955_v8  ;;  %v971_v24 = vld [vmem:[%s1284_s2 + $0x48] sm:$0xff]   ;;  %v975_v29 = vld [vmem:[%s1284_s2 + $0x40] sm:$0xff]   ;;  %v980_v35 = vld [vmem:[%s1284_s2 + $0x178] sm:$0xff]  }
   0xa   :  { %882 = vmatprep.subr.bf16.mxu1 %v956_v9  ;;  %v972_v25 = vld [vmem:[%s1284_s2 + $0xc8] sm:$0xff]   ;;  %v976_v30 = vld [vmem:[%s1284_s2 + $0xc0] sm:$0xff]   ;;  %v981_v38 = vld [vmem:[%s1284_s2 + $0x1f8] sm:$0xff]  }
   0xb   :  { %v973_v26 = vld [vmem:[%s1284_s2 + $0x8] sm:$0xff]   ;;  %v977_v31 = vld [vmem:[%s1284_s2] sm:$0xff]   ;;  %v982_v48 = vld [vmem:[%s1284_s2 + $0x138] sm:$0xff]  }
   0xc   :  { %861 = vmatpush3.bf16.msra.mxu0 %v957_v10  ;;  %v974_v27 = vld [vmem:[%s1284_s2 + $0x88] sm:$0xff]   ;;  %v978_v32 = vld [vmem:[%s1284_s2 + $0x80] sm:$0xff]   ;;  %v984_v51 = vld [vmem:[%s1284_s2 + $0x170] sm:$0xff]  }
   0xd   :  { %883 = vmatpush3.bf16.msra.mxu1 %v958_v11  ;;  %862 = vmatprep.subr.bf16.mxu0 %v959_v12  ;;  %v27_v34 = vld [vmem:[%s1283_s1] sm:$0xff]  ;;  %v983_v53 = vld [vmem:[%s1284_s2 + $0x1b8] sm:$0xff]   ;;  %v985_v54 = vld [vmem:[%s1284_s2 + $0x1f0] sm:$0xff]  }
   0xe   :  { %884 = vmatprep.subr.bf16.mxu1 %v960_v13  ;;  %v157_v39 = vcombine.high %v27_v34, %v27_v34  ;;  %v164_v42 = vrot.slane %v27_v34, %v1167_v41  ;;  %v986_v56 = vld [vmem:[%s1284_s2 + $0x130] sm:$0xff]   ;;  %v988_v57 = vld [vmem:[%s1284_s2 + $0x168] sm:$0xff]   ;;  %v992_v61 = vld [vmem:[%s1284_s2 + $0x160] sm:$0xff]  }
   0xf   :  { %v987_v58 = vld [vmem:[%s1284_s2 + $0x1b0] sm:$0xff]   ;;  %v989_v59 = vld [vmem:[%s1284_s2 + $0x1e8] sm:$0xff]   ;;  %v993_v63 = vld [vmem:[%s1284_s2 + $0x1e0] sm:$0xff]  }
  0x10   :  { %863 = vmatpush3.bf16.msra.mxu0 %v961_v14  ;;  %v1171_v43 = vrot.slane %v157_v39, %v1167_v41  ;;  %v172_v44 = vcombine.high %v164_v42, %v164_v42  ;;  %v180_v45 = vrot.slane %v164_v42, %v1167_v41  ;;  %v990_v60 = vld [vmem:[%s1284_s2 + $0x128] sm:$0xff]   ;;  %v994_v0 = vld [vmem:[%s1284_s2 + $0x120] sm:$0xff]   ;;  %v996_v1 = vld [vmem:[%s1284_s2 + $0x158] sm:$0xff]  }
  0x11   :  { %885 = vmatpush3.bf16.msra.mxu1 %v962_v15  ;;  %864 = vmatprep.subr.bf16.mxu0 %v963_v16  ;;  %v991_v62 = vld [vmem:[%s1284_s2 + $0x1a8] sm:$0xff]   ;;  %v995_v2 = vld [vmem:[%s1284_s2 + $0x1a0] sm:$0xff]   ;;  %v997_v3 = vld [vmem:[%s1284_s2 + $0x1d8] sm:$0xff]  }
  0x12   :  { %886 = vmatprep.subr.bf16.mxu1 %v964_v17  ;;  %v173_v46 = vcombine.high %v1171_v43, %v1171_v43  ;;  %v194_v47 = vrot.slane %v172_v44, %v1167_v41  ;;  %v202_v50 = vcombine.high %v180_v45, %v180_v45  ;;  %v998_v4 = vld [vmem:[%s1284_s2 + $0x118] sm:$0xff]   ;;  %v1000_v5 = vld [vmem:[%s1284_s2 + $0x150] sm:$0xff]   ;;  %v1004_v9 = vld [vmem:[%s1284_s2 + $0x148] sm:$0xff]  }
  0x13   :  { %v999_v6 = vld [vmem:[%s1284_s2 + $0x198] sm:$0xff]   ;;  %v1001_v7 = vld [vmem:[%s1284_s2 + $0x1d0] sm:$0xff]  }
  0x14   :  { %865 = vmatpush3.bf16.msra.mxu0 %v965_v18  ;;  %v201_v49 = vrot.slane %v173_v46, %v1167_v41  ;;  %630 = vmatprep.mubr.bf16.mxu0 %v194_v47  ;;  %v204_v52 = vcombine.high %v194_v47, %v194_v47  ;;  %v1002_v8 = vld [vmem:[%s1284_s2 + $0x110] sm:$0xff]  }
  0x15   :  { %887 = vmatpush3.bf16.msra.mxu1 %v966_v19  ;;  %866 = vmatprep.subr.bf16.mxu0 %v967_v20 }
  0x16   :  { %888 = vmatprep.subr.bf16.mxu1 %v968_v21  ;;  %v205_v55 = vcombine.high %v201_v49, %v201_v49  ;;  %670 = vmatprep.mubr.bf16.mxu1 %v204_v52 }
  0x18   :  { %867 = vmatpush3.bf16.msra.mxu0 %v969_v22 }
  0x19   :  { %889 = vmatpush3.bf16.msra.mxu1 %v970_v23  ;;  %868 = vmatprep.subr.bf16.mxu0 %v971_v24 }
  0x1a   :  { %890 = vmatprep.subr.bf16.mxu1 %v972_v25 }
  0x1c   :  { %869 = vmatpush3.bf16.msra.mxu0 %v973_v26 }
  0x1d   :  { %891 = vmatpush3.bf16.msra.mxu1 %v974_v27  ;;  %870 = vmatprep.subr.bf16.mxu0 %v975_v29 }
  0x1e   :  { %892 = vmatprep.subr.bf16.mxu1 %v976_v30 }
  0x20   :  { %871 = vmatpush3.bf16.msra.mxu0 %v977_v31 }
  0x21   :  { %893 = vmatpush3.bf16.msra.mxu1 %v978_v32  ;;  %900 = vmatprep.subr.bf16.mxu0 %v980_v35 }
  0x22   :  { %922 = vmatprep.subr.bf16.mxu1 %v981_v38 }
  0x23   :  { %631 = vmatmul.mubr.bf16.vlgmr.msra.gmra.mxu0 %v180_v45 }
  0x24   :  { %901 = vmatpush3.bf16.msra.mxu0 %v982_v48  ;;  %671 = vmatmul.mubr.bf16.vlgmr.msra.gmra.mxu1 %v202_v50 }
  0x25   :  { %902 = vmatprep.subr.bf16.mxu0 %v984_v51  ;;  %923 = vmatpush3.bf16.msra.mxu1 %v983_v53 }
  0x26   :  { %710 = vmatprep.mubr.bf16.mxu0 %v201_v49  ;;  %924 = vmatprep.subr.bf16.mxu1 %v985_v54 }
  0x27   :  { %750 = vmatprep.mubr.bf16.mxu1 %v205_v55 }
  0x28   :  { %903 = vmatpush3.bf16.msra.mxu0 %v986_v56 }
  0x29   :  { %904 = vmatprep.subr.bf16.mxu0 %v988_v57  ;;  %925 = vmatpush3.bf16.msra.mxu1 %v987_v58 }
  0x2a   :  { %926 = vmatprep.subr.bf16.mxu1 %v989_v59 }
  0x2c   :  { %905 = vmatpush3.bf16.msra.mxu0 %v990_v60 }
  0x2d   :  { %906 = vmatprep.subr.bf16.mxu0 %v992_v61  ;;  %927 = vmatpush3.bf16.msra.mxu1 %v991_v62 }
  0x2e   :  { %928 = vmatprep.subr.bf16.mxu1 %v993_v63 }
  0x30   :  { %907 = vmatpush3.bf16.msra.mxu0 %v994_v0 }
  0x31   :  { %908 = vmatprep.subr.bf16.mxu0 %v996_v1  ;;  %929 = vmatpush3.bf16.msra.mxu1 %v995_v2 }
  0x32   :  { %930 = vmatprep.subr.bf16.mxu1 %v997_v3 }
  0x34   :  { %909 = vmatpush3.bf16.msra.mxu0 %v998_v4 }
  0x35   :  { %910 = vmatprep.subr.bf16.mxu0 %v1000_v5 }
  0x36   :  { %10 = vsyncpa [#allocation4], 0  ;;  %931 = vmatpush3.bf16.msra.mxu1 %v999_v6  ;;  %v1003_v10 = vld [vmem:[%s1284_s2 + $0x190] sm:$0xff]   ;;  %v1005_v11 = vld [vmem:[%s1284_s2 + $0x1c8] sm:$0xff]   ;;  %v187_v17 = vrot.slane %v1171_v43, %v1167_v41  ;;  %vm24_vm0 = vcmask 189440   ;;  %v1035_v20 = vmov 0.0   ;;  %v774_v48 = vstv %s1282_s0 }
  0x37   :  { %932 = vmatprep.subr.bf16.mxu1 %v1001_v7  ;;  %v1006_v12 = vld [vmem:[%s1284_s2 + $0x108] sm:$0xff]   ;;  %v1008_v13 = vld [vmem:[%s1284_s2 + $0x140] sm:$0xff]   ;;  %25 = vst.msk [vmem:[#allocation3] sm:$0x3] %vm24_vm0, %v1035_v20  ;;  %s1036_s15 = smov [#allocation3]  }
  0x38   :  { %911 = vmatpush3.bf16.msra.mxu0 %v1002_v8  ;;  %v1007_v14 = vld [vmem:[%s1284_s2 + $0x188] sm:$0xff]   ;;  %v1009_v15 = vld [vmem:[%s1284_s2 + $0x1c0] sm:$0xff]   ;;  %v203_v19 = vcombine.high %v187_v17, %v187_v17  ;;  %s783_s16 = sshll.u32 %s1036_s15, 4  ;;  %s784_s16 = int_to_ptr.vmem [resolvable:$true] %s783_s16 }
  0x39   :  { %912 = vmatprep.subr.bf16.mxu0 %v1004_v9  ;;  %v1010_v16 = vld [vmem:[%s1284_s2 + $0x100] sm:$0xff]   ;;  %s1012_s17 = scalar_lea.vmem %s784_s16, 32  ;;  %p1017_p1 = scmp.lt.s32.totalorder %s784_s16, %s784_s16 }
  0x3a   :  { %933 = vmatpush3.bf16.msra.mxu1 %v1003_v10  ;;  %v1011_v18 = vld [vmem:[%s1284_s2 + $0x180] sm:$0xff]   ;;  %p1013_p0 = scmp.ne.s32.totalorder %s784_s16, %s1012_s17  ;;  %p1018_p2 = scmp.lt.s32.totalorder %s1012_s17, %s1012_s17 }
  0x3b   :  { %934 = vmatprep.subr.bf16.mxu1 %v1005_v11  ;;  %v855_v46 = vld [vmem:[%s1285_s3] ss:$0 sm:$0xff] }
  0x3c   :  { %913 = vmatpush3.bf16.msra.mxu0 %v1006_v12  ;;  %p1019_p3 = por %p1018_p2, %p1017_p1 }
  0x3d   :  { %914 = vmatprep.subr.bf16.mxu0 %v1008_v13 }
  0x3e   :  { %935 = vmatpush3.bf16.msra.mxu1 %v1007_v14  ;;  %v26_v40 = vld [vmem:[#allocation3] sm:$0x3]  ;;  %p1020_p4 = pnand %p1019_p3, %p1013_p0 }
  0x3f   :  { %936 = vmatprep.subr.bf16.mxu1 %v1009_v15 }
  0x40   :  { %915 = vmatpush3.bf16.msra.mxu0 %v1010_v16 }
  0x42   :  { %937 = vmatpush3.bf16.msra.mxu1 %v1011_v18 }
  0x43   :  { %711 = vmatmul.mubr.bf16.vlgmr.msra.gmra.mxu0 %v187_v17 }
  0x45   :  { %751 = vmatmul.mubr.bf16.vlgmr.msra.gmra.mxu1 %v203_v19 }
  0xe3   :  { %v872_v21 = vpop.f32.mrf.mxu0 }
  0xe4   :  { %v894_v22 = vpop.f32.mrf.mxu1 }
  0xe5   :  { %v873_v23 = vpop.f32.mrf.mxu0 }
  0xe6   :  { %v895_v24 = vpop.f32.mrf.mxu1  ;;  %v874_v29 = vadd.f32 %v873_v23, %v872_v21 }
  0xe7   :  { %v875_v25 = vpop.f32.mrf.mxu0  ;;  %v896_v30 = vadd.f32 %v895_v24, %v894_v22 }
  0xe8   :  { %v897_v26 = vpop.f32.mrf.mxu1 }
  0xe9   :  { %v876_v27 = vpop.f32.mrf.mxu0  ;;  %v673_v34 = vadd.f32 %v896_v30, %v874_v29 }
  0xea   :  { %v898_v28 = vpop.f32.mrf.mxu1 }
 0x103   :  { %v916_v31 = vpop.f32.mrf.mxu0 }
 0x105   :  { %v938_v32 = vpop.f32.mrf.mxu1  ;;  %v917_v33 = vpop.f32.mrf.mxu0 }
 0x106   :  { %v918_v35 = vadd.f32 %v917_v33, %v916_v31 }
 0x107   :  { %v939_v36 = vpop.f32.mrf.mxu1  ;;  %v919_v37 = vpop.f32.mrf.mxu0 }
 0x108   :  { %v713_v38 = vadd.f32 %v918_v35, %v673_v34  ;;  %v940_v39 = vadd.f32 %v939_v36, %v938_v32 }
 0x109   :  { %v941_v41 = vpop.f32.mrf.mxu1  ;;  %v920_v42 = vpop.f32.mrf.mxu0 }
 0x10a   :  { %v753_v43 = vadd.f32 %v940_v39, %v713_v38 }
 0x10b   :  { %v942_v44 = vpop.f32.mrf.mxu1 }
 0x10c   :  { %v758_v45 = vadd.f32 %v753_v43, %v26_v40 }
 0x10e   :  { %760 = vst.msk [vmem:[#allocation3] sm:$0x3] %vm24_vm0, %v758_v45 }
 0x115   :  { %v764_v47 = vld [vmem:[#allocation3] sm:$0x3] }
 0x116   :  { %v772_v49 = vadd.f32 %v855_v46, %v764_v47 }
 0x118   :  { %v775_v50 = vmul.f32 %v774_v48, %v772_v49 }
 0x11a   :  { %776 = vst.msk [vmem:[#allocation3] sm:$0x3] %vm24_vm0, %v775_v50 }
 0x11b   :  { %1023 = shalt.err (!%p1020_p4)
}
 0x11c   :  { %786 = dma.vmem_to_hbm [thread:$0]  %s784_s16, 32, %s1286_s4, [#allocation4]  }
 0x11d   :  { %1032 = dma.done.wait [#allocation4], 32  }
 0x11e   :  { %1033 = vsyncadd [#allocation4], 4294967264 }
 0x11f   :  { %790 = vsyncpa [#allocation4], 1 }

</bundles_post_ra>
